<compile_context>
chip_gen: v6e
topology: v6e:2x2x1
jax: 0.10.0
libtpu: 0.0.40
codegen_flags: <defaults>
</compile_context>

<pallas_src>
import functools

import jax
import jax.numpy as jnp
from jax import lax
from jax.experimental import pallas as pl
from jax.experimental.pallas import tpu as pltpu


def _scene_contraction_kernel(x_ref, o_ref, *, order):
    x = x_ref[...]                                  # (D, TILE), lane-dense
    xf = x if x.dtype == jnp.float32 else x.astype(jnp.float32)
    D = xf.shape[0]

    if order is None or order == 2:
        # ||x||_2: pure-VPU sum of squares over the (tiny) sublane axis,
        # branch on sumsq < 1 (equivalent to mag < 1), single EUP rsqrt.
        sumsq = xf[0:1, :] * xf[0:1, :]
        for d in range(1, D):
            sumsq = sumsq + xf[d:d + 1, :] * xf[d:d + 1, :]
        inside = sumsq < 1.0                         # (1, TILE)
        inv = lax.rsqrt(jnp.where(inside, 1.0, sumsq))   # inv = 1/mag
    elif order == float("inf"):
        mag = jnp.abs(xf[0:1, :])
        for d in range(1, D):
            mag = jnp.maximum(mag, jnp.abs(xf[d:d + 1, :]))
        inside = mag < 1.0
        inv = pl.reciprocal(jnp.where(inside, 1.0, mag), approx=False)
    else:
        p = float(order)
        s = jnp.power(jnp.abs(xf[0:1, :]), p)
        for d in range(1, D):
            s = s + jnp.power(jnp.abs(xf[d:d + 1, :]), p)
        mag = jnp.power(s, 1.0 / p)
        inside = mag < 1.0
        inv = pl.reciprocal(jnp.where(inside, 1.0, mag), approx=False)

    # scale = 1 inside the unit ball, (2 - 1/mag)/mag outside.
    scale = jnp.where(inside, 1.0, (2.0 - inv) * inv)    # (1, TILE)
    o_ref[...] = (xf * scale).astype(o_ref.dtype)        # sublane broadcast


def scene_contraction(positions, order=None, *, tile=128 * 1024):
    """Pallas implementation of SceneContraction.forward.

    positions: array of shape (..., D) (D = 3 for NeRF positions).
    """
    orig_shape = positions.shape
    orig_dtype = positions.dtype
    D = orig_shape[-1]

    x = positions.reshape(-1, D)
    n = x.shape[0]

    # One-time lane-dense transpose: (N, D) -> (D, N).  Layout plumbing only.
    xt = jnp.transpose(x, (1, 0))

    # Tile sizing: large multiple of 128, but never bigger than (padded) N.
    n_128 = pl.cdiv(max(n, 1), 128) * 128
    tile = int(max(128, min(tile, n_128)))
    n_pad = pl.cdiv(max(n, 1), tile) * tile
    if n_pad != n:
        # Zero-padded tail rows have mag = 0 < 1 -> identity branch (inert).
        xt = jnp.pad(xt, ((0, 0), (0, n_pad - n)))

    grid = (n_pad // tile,)
    kernel = functools.partial(_scene_contraction_kernel, order=order)

    out_t = pl.pallas_call(
        kernel,
        out_shape=jax.ShapeDtypeStruct((D, n_pad), orig_dtype),
        grid_spec=pltpu.PrefetchScalarGridSpec(
            num_scalar_prefetch=0,
            grid=grid,
            in_specs=[pl.BlockSpec((D, tile), lambda i: (0, i))],
            out_specs=pl.BlockSpec((D, tile), lambda i: (0, i)),
        ),
        compiler_params=pltpu.CompilerParams(
            dimension_semantics=("parallel",)),
    )(xt)

    # Transpose back to the caller's (..., D) layout.
    return jnp.transpose(out_t[:, :n], (1, 0)).reshape(orig_shape)


def _reference(positions, order=None):
    if order is None or order == 2:
        mag = jnp.linalg.norm(positions, axis=-1, keepdims=True)
    elif order == float("inf"):
        mag = jnp.max(jnp.abs(positions), axis=-1, keepdims=True)
    else:
        mag = jnp.sum(jnp.abs(positions) ** order,
                      axis=-1, keepdims=True) ** (1.0 / order)
    return jnp.where(mag < 1, positions, (2 - 1 / mag) * (positions / mag))


if __name__ == "__main__":
    key = jax.random.PRNGKey(0)

    # Small ray batch: (batch=2, num_samples=128, xyz=3); values span inside
    # and outside the unit ball so both branches of the contraction fire.
    positions = 3.0 * jax.random.normal(key, (2, 128, 3), dtype=jnp.float32)

    out = scene_contraction(positions, order=None)
    out = jax.block_until_ready(out)
    ref = _reference(positions, order=None)
    assert out.shape == positions.shape and out.dtype == positions.dtype
    assert jnp.allclose(out, ref, atol=1e-5, rtol=1e-5)

    # Ragged N (not a multiple of 128) + L-inf norm path.
    k2 = jax.random.PRNGKey(1)
    pos2 = 2.0 * jax.random.normal(k2, (3, 50, 3), dtype=jnp.float32)
    out2 = jax.block_until_ready(scene_contraction(pos2, order=float("inf")))
    ref2 = _reference(pos2, order=float("inf"))
    assert jnp.allclose(out2, ref2, atol=1e-5, rtol=1e-5)

    print("KERNEL_OK")
</pallas_src>

<mosaic_0001>
module attributes {stable_mosaic.version = 11 : i64} {
  func.func @_scene_contraction_kernel(%arg0: i32, %arg1: memref<3x256xf32, #tpu.memory_space<vmem>>, %arg2: memref<3x256xf32, #tpu.memory_space<vmem>>) attributes {dimension_semantics = [#tpu.dimension_semantics<parallel>], iteration_bounds = array<i64: 1>, scalar_prefetch = 0 : i64, scratch_operands = 0 : i64, tpu.core_type = #tpu.core_type<tc>, window_params = [{transform_indices = @transform_0, window_bounds = array<i64: 3, 256>}, {transform_indices = @transform_1, window_bounds = array<i64: 3, 256>}]} {
    %c0 = arith.constant 0 : index
    %c0_0 = arith.constant 0 : index
    %0 = vector.load %arg1[%c0, %c0_0] : memref<3x256xf32, #tpu.memory_space<vmem>>, vector<3x256xf32>
    %1 = vector.extract_strided_slice %0 {offsets = [0, 0], sizes = [1, 256], strides = [1, 1]} : vector<3x256xf32> to vector<1x256xf32>
    %2 = vector.extract_strided_slice %0 {offsets = [0, 0], sizes = [1, 256], strides = [1, 1]} : vector<3x256xf32> to vector<1x256xf32>
    %3 = arith.mulf %1, %2 : vector<1x256xf32>
    %4 = vector.extract_strided_slice %0 {offsets = [1, 0], sizes = [1, 256], strides = [1, 1]} : vector<3x256xf32> to vector<1x256xf32>
    %5 = vector.extract_strided_slice %0 {offsets = [1, 0], sizes = [1, 256], strides = [1, 1]} : vector<3x256xf32> to vector<1x256xf32>
    %6 = arith.mulf %4, %5 : vector<1x256xf32>
    %7 = arith.addf %3, %6 : vector<1x256xf32>
    %8 = vector.extract_strided_slice %0 {offsets = [2, 0], sizes = [1, 256], strides = [1, 1]} : vector<3x256xf32> to vector<1x256xf32>
    %9 = vector.extract_strided_slice %0 {offsets = [2, 0], sizes = [1, 256], strides = [1, 1]} : vector<3x256xf32> to vector<1x256xf32>
    %10 = arith.mulf %8, %9 : vector<1x256xf32>
    %11 = arith.addf %7, %10 : vector<1x256xf32>
    %cst = arith.constant 1.000000e+00 : f32
    %12 = vector.broadcast %cst : f32 to vector<1x256xf32>
    %13 = arith.cmpf olt, %11, %12 : vector<1x256xf32>
    %cst_1 = arith.constant 1.000000e+00 : f32
    %14 = vector.broadcast %cst_1 : f32 to vector<1x256xf32>
    %15 = arith.select %13, %14, %11 : vector<1x256xi1>, vector<1x256xf32>
    %16 = math.rsqrt %15 : vector<1x256xf32>
    %cst_2 = arith.constant 2.000000e+00 : f32
    %17 = vector.broadcast %cst_2 : f32 to vector<1x256xf32>
    %18 = arith.subf %17, %16 : vector<1x256xf32>
    %19 = arith.mulf %18, %16 : vector<1x256xf32>
    %cst_3 = arith.constant 1.000000e+00 : f32
    %20 = vector.broadcast %cst_3 : f32 to vector<1x256xf32>
    %21 = arith.select %13, %20, %19 : vector<1x256xi1>, vector<1x256xf32>
    %22 = vector.broadcast %21 : vector<1x256xf32> to vector<3x256xf32>
    %23 = arith.mulf %0, %22 : vector<3x256xf32>
    %c0_4 = arith.constant 0 : index
    %c0_5 = arith.constant 0 : index
    %24 = vector.load %arg2[%c0_4, %c0_5] : memref<3x256xf32, #tpu.memory_space<vmem>>, vector<3x256xf32>
    tpu.vector_store %arg2[%c0_4, %c0_5], %23 {strides = array<i32>} : memref<3x256xf32, #tpu.memory_space<vmem>>, vector<3x256xf32>,
    return
  }
  func.func @transform_0(%arg0: i32) -> (i32, i32) {
    %c0_i32 = arith.constant 0 : i32
    %c0_i32_0 = arith.constant 0 : i32
    return %c0_i32, %arg0 : i32, i32
  }
  func.func @transform_1(%arg0: i32) -> (i32, i32) {
    %c0_i32 = arith.constant 0 : i32
    %c0_i32_0 = arith.constant 0 : i32
    return %c0_i32, %arg0 : i32, i32
  }
}

</mosaic_0001>

<bundles_post_ra>
// kernel: tpu_custom_call.1
= control target key start
LH: loop header
LB: loop body
LE: loop exit
PB: predicated region body
PF: predicated region fallthrough
CT: control target
= control target key end

     0   :  { %6 = vsyncpa [#allocation3], 0  ;;  %s146_s0 = inlined_call_operand.hbm [shape: f32[3,256], index: 0, kind: input, shape index: {}]   ;;  %s147_s1 = inlined_call_operand.hbm [shape: f32[3,256], index: 1, kind: output, shape index: {}]  }
   0x1   :  { %7 = vsyncpa [#allocation4], 0  ;;  %s128_s6 = smov [#allocation2]  }
   0x2   :  { %s14_s7 = sshll.u32 %s128_s6, 4  ;;  %s15_s7 = int_to_ptr.vmem [resolvable:$true] %s14_s7 }
   0x3   :  { %s92_s8 = scalar_lea.vmem %s15_s7, 128  ;;  %p97_p1 = scmp.lt.s32.totalorder %s15_s7, %s15_s7 }
   0x4   :  { %p93_p0 = scmp.ne.s32.totalorder %s15_s7, %s92_s8  ;;  %p98_p2 = scmp.lt.s32.totalorder %s92_s8, %s92_s8 }
   0x6   :  { %p99_p3 = por %p98_p2, %p97_p1 }
   0x8   :  { %p100_p4 = pnand %p99_p3, %p93_p0 }
   0xa   :  { %103 = shalt.err (!%p100_p4)
}
   0xb   :  { %17 = dma.hbm_to_vmem [thread:$0]  %s146_s0, 128, %s15_s7, [#allocation3]  }
   0xc   :  { %124 = dma.done.wait [#allocation3], 128  }
   0xd   :  { %125 = vsyncadd [#allocation3], 4294967168  ;;  %v21_v0 = vld [vmem:[#allocation2] sm:$0x77]  ;;  %v39_v7 = vlaneseq  ;;  %s129_s0 = smov [#allocation5]  }
   0xe   :  { %v22_v1 = vmul.f32 %v21_v0, %v21_v0  ;;  %s69_s11 = sshll.u32 %s129_s0, 4  ;;  %s70_s11 = int_to_ptr.vmem [resolvable:$true] %s69_s11 }
   0xf   :  { %v40_v8 = vshrl.u32 %v39_v7, 7  ;;  %s104_s12 = scalar_lea.vmem %s70_s11, 128  ;;  %p109_p6 = scmp.lt.s32.totalorder %s70_s11, %s70_s11 }
  0x10   :  { %v78_v2 = vrot.slane %v22_v1, 9  ;;  %v79_v3 = vrot.slane %v22_v1, 10  ;;  %p105_p5 = scmp.ne.s32.totalorder %s70_s11, %s104_s12  ;;  %p110_p7 = scmp.lt.s32.totalorder %s104_s12, %s104_s12 }
  0x11   :  { %v41_v11 = vsub.s32 0, %v40_v8  ;;  %v45_v12 = vsub.s32 4, %v40_v8 }
  0x12   :  { %v27_v4 = vadd.f32 %v78_v2, %v22_v1  ;;  %p111_p8 = por %p110_p7, %p109_p6 }
  0x14   :  { %v31_v5 = vadd.f32 %v79_v3, %v27_v4  ;;  %p112_p9 = pnand %p111_p8, %p105_p5 }
  0x16   :  { %vm32_vm0 = vcmp.lt.f32.partialorder %v31_v5, 1.0 }
  0x17   :  { %v33_v6 = vsel %vm32_vm0, 1.0, %v31_v5 }
  0x18   :  { %82 = vrsqrt.f32 %v33_v6 }
  0x25   :  { %v83_v9 = vpop.eup %82 }
  0x26   :  { %v35_v10 = vsub.f32 2.0, %v83_v9 }
  0x28   :  { %v36_v13 = vmul.f32 %v83_v9, %v35_v10 }
  0x2a   :  { %v37_v14 = vsel %vm32_vm0, 1.0, %v36_v13 }
  0x2b   :  { %v42_v15 = vrot.slane %v37_v14, %v41_v11  ;;  %v46_v16 = vrot.slane %v37_v14, %v45_v12 }
  0x2d   :  { %v52_v17 = vrot.slane %v42_v15, %v41_v11  ;;  %v56_v18 = vrot.slane %v46_v16, %v41_v11 }
  0x2f   :  { %v59_v19 = vcombine.low %v52_v17, %v56_v18 }
  0x31   :  { %v61_v20 = vmul.f32 %v59_v19, %v21_v0 }
  0x33   :  { %62 = vst [vmem:[#allocation5] sm:$0x77] %v61_v20 }
  0x34   :  { %115 = shalt.err (!%p112_p9)
}
  0x35   :  { %72 = dma.vmem_to_hbm [thread:$0]  %s70_s11, 128, %s147_s1, [#allocation4]  }
  0x36   :  { %126 = dma.done.wait [#allocation4], 128  }
  0x37   :  { %127 = vsyncadd [#allocation4], 4294967168 }
  0x38   :  { %76 = vsyncpa [#allocation3], 1 }
  0x39   :  { %77 = vsyncpa [#allocation4], 1 }

</bundles_post_ra>
